<compile_context>
chip_gen: v5e
topology: v5e:2x2
jax: 0.10.0
libtpu: 0.0.40
codegen_flags: <defaults>
</compile_context>

<pallas_src>
import functools

import jax
import jax.numpy as jnp
from jax import lax
from jax.experimental import pallas as pl
from jax.experimental.pallas import tpu as pltpu

N_EMBED = 384          # from the module
BLOCK_SIZE = 256       # module's tril buffer size (max sequence length)


def _head_kernel(x_ref, w_ref, o_ref, *, tq, head_size, seq_len):
    # x_ref: (T, C) bf16 block (batch dim squeezed)
    # w_ref: (C, 4H) bf16 fused weight = [Wv | Wk | 0 | Wq * C**-0.5]
    # o_ref: (T, H) f32 output block
    H = head_size
    T = seq_len
    num_q = T // tq

    # Fused projection, computed ONCE per batch element and reused by every
    # q-tile below (bf16 MXU operands, f32 accumulation).
    proj = jnp.dot(x_ref[...], w_ref[...],
                   preferred_element_type=jnp.float32)        # (T, 4H)
    proj_bf = proj.astype(jnp.bfloat16)
    kv = proj_bf[:, :2 * H]          # (T, 2H) = [V | K], lane-aligned at 0
    qz = proj_bf[:, 2 * H:]          # (T, 2H) = [0 | scaled Q], aligned at 2H

    # Statically unrolled loop over query-row tiles (num_q is 1 or 2 here):
    # bounds the live (tq, kT) f32 softmax intermediates without re-running
    # the projection, and keeps all slices static.
    for qi in range(num_q):
        q_start = qi * tq
        k_len = q_start + tq                      # causal: only first k_len keys
        q_tile = qz[q_start:q_start + tq, :]      # (tq, 2H)
        kv_t = kv[:k_len, :]                      # (k_len, 2H)

        # scores = (scaled q) @ k^T, contracting the shared 2H axis; the
        # zero-padded half of q_tile cancels the V half of kv_t.
        wei = lax.dot_general(q_tile, kv_t, (((1,), (1,)), ((), ())),
                              preferred_element_type=jnp.float32)  # (tq, k_len)

        # Causal mask, offset by this tile's first global query row.
        row = lax.broadcasted_iota(jnp.int32, (tq, k_len), 0) + q_start
        col = lax.broadcasted_iota(jnp.int32, (tq, k_len), 1)
        wei = jnp.where(col <= row, wei, -jnp.inf)

        # Softmax in f32; approx reciprocal uses the otherwise-idle EUP.
        m = jnp.max(wei, axis=-1, keepdims=True)
        e = jnp.exp(wei - m)
        denom = jnp.sum(e, axis=-1, keepdims=True)
        p = (e * pl.reciprocal(denom, approx=True)).astype(jnp.bfloat16)

        # p @ [V | K] -> (tq, 2H); the attention output is the V half, an
        # aligned-start slice of a small result.  Dropout is identity (eval).
        out_vk = jnp.dot(p, kv_t, preferred_element_type=jnp.float32)
        o_ref[q_start:q_start + tq, :] = out_vk[:, :H].astype(o_ref.dtype)


def head_forward(x, wq, wk, wv):
    """x: (B, T, C) f32; wq/wk/wv: (C, H) f32 (nn.Linear weights, transposed) -> (B, T, H)."""
    B, T, C = x.shape
    H = wq.shape[1]
    scale = float(C) ** (-0.5)

    # Fused weight, bf16, laid out so every in-kernel slice is 128-lane aligned
    # (for H=64): [Wv | Wk | zeros | Wq * C**-0.5].  Scale folded into Wq.
    zeros = jnp.zeros((C, H), dtype=wq.dtype)
    w_fused = jnp.concatenate([wv, wk, zeros, wq * scale],
                              axis=1).astype(jnp.bfloat16)      # (C, 4H)
    x_bf = x.astype(jnp.bfloat16)

    # Query-row tile size for the in-kernel loop.
    if T > 128 and T % 128 == 0:
        tq = 128
    else:
        tq = T

    kernel = functools.partial(_head_kernel, tq=tq, head_size=H, seq_len=T)

    cost = pl.CostEstimate(
        flops=2 * B * T * C * (4 * H)            # fused projection
              + 2 * 2 * B * T * T * (2 * H),     # QK^T + PV (upper bound)
        transcendentals=B * T * T,               # softmax exp
        bytes_accessed=B * T * C * 2 + C * (4 * H) * 2 + B * T * H * 4,
    )

    return pl.pallas_call(
        kernel,
        out_shape=jax.ShapeDtypeStruct((B, T, H), x.dtype),
        grid_spec=pltpu.PrefetchScalarGridSpec(
            num_scalar_prefetch=0,
            grid=(B,),
            in_specs=[
                pl.BlockSpec((None, T, C), lambda b: (b, 0, 0)),
                pl.BlockSpec((C, 4 * H), lambda b: (0, 0)),
            ],
            out_specs=pl.BlockSpec((None, T, H), lambda b: (b, 0, 0)),
        ),
        compiler_params=pltpu.CompilerParams(
            dimension_semantics=("parallel",)),
        cost_estimate=cost,
    )(x_bf, w_fused)


def head_reference(x, wq, wk, wv):
    """Pure-JAX f32 reference mirroring the PyTorch forward (eval mode)."""
    B, T, C = x.shape
    q = x @ wq
    k = x @ wk
    v = x @ wv
    wei = (q @ jnp.swapaxes(k, -2, -1)) * (C ** -0.5)
    tril = jnp.tril(jnp.ones((T, T), dtype=bool))
    wei = jnp.where(tril, wei, -jnp.inf)
    wei = jax.nn.softmax(wei, axis=-1)
    return wei @ v


def _make_inputs(key, B, T, C, H):
    kx, kq, kk, kv = jax.random.split(key, 4)
    x = jax.random.normal(kx, (B, T, C), dtype=jnp.float32)
    lim = (1.0 / C) ** 0.5          # nn.Linear default init range
    wq = jax.random.uniform(kq, (C, H), jnp.float32, -lim, lim)
    wk = jax.random.uniform(kk, (C, H), jnp.float32, -lim, lim)
    wv = jax.random.uniform(kv, (C, H), jnp.float32, -lim, lim)
    return x, wq, wk, wv


if __name__ == "__main__":
    key = jax.random.PRNGKey(0)
    C, head_size = N_EMBED, 64

    # Small demo shape (single q-tile path).
    x, wq, wk, wv = _make_inputs(key, B=2, T=8, C=C, H=head_size)
    out = jax.block_until_ready(head_forward(x, wq, wk, wv))
    ref = head_reference(x, wq, wk, wv)
    assert out.shape == (2, 8, head_size)
    # bf16 MXU operands (f32 accumulation) -> compare to f32 reference loosely.
    assert jnp.allclose(out, ref, atol=2e-2, rtol=2e-2)

    # block_size-scale check (exercises the in-kernel q-tile loop, T=256, tq=128).
    x2, wq2, wk2, wv2 = _make_inputs(jax.random.PRNGKey(1),
                                     B=2, T=BLOCK_SIZE, C=C, H=head_size)
    out2 = jax.block_until_ready(head_forward(x2, wq2, wk2, wv2))
    ref2 = head_reference(x2, wq2, wk2, wv2)
    assert out2.shape == (2, BLOCK_SIZE, head_size)
    assert jnp.allclose(out2, ref2, atol=2e-2, rtol=2e-2)

    print("KERNEL_OK")
</pallas_src>

<mosaic_0001>
module attributes {stable_mosaic.version = 11 : i64} {
  func.func @_head_kernel(%arg0: i32, %arg1: memref<1x8x384xbf16, #tpu.memory_space<vmem>>, %arg2: memref<384x256xbf16, #tpu.memory_space<vmem>>, %arg3: memref<1x8x64xf32, #tpu.memory_space<vmem>>) attributes {dimension_semantics = [#tpu.dimension_semantics<parallel>], iteration_bounds = array<i64: 2>, scalar_prefetch = 0 : i64, scratch_operands = 0 : i64, tpu.core_type = #tpu.core_type<tc>, window_params = [{transform_indices = @transform_0, window_bounds = array<i64: 1, 8, 384>}, {pipeline_mode = #tpu.pipeline_mode<synchronous>, transform_indices = @transform_1, window_bounds = array<i64: 384, 256>}, {transform_indices = @transform_2, window_bounds = array<i64: 1, 8, 64>}]} {
    %c0 = arith.constant 0 : index
    %c0_0 = arith.constant 0 : index
    %c0_1 = arith.constant 0 : index
    %0 = vector.load %arg1[%c0, %c0_0, %c0_1] : memref<1x8x384xbf16, #tpu.memory_space<vmem>>, vector<1x8x384xbf16>
    %1 = vector.shape_cast %0 : vector<1x8x384xbf16> to vector<8x384xbf16>
    %c0_2 = arith.constant 0 : index
    %c0_3 = arith.constant 0 : index
    %2 = vector.load %arg2[%c0_2, %c0_3] : memref<384x256xbf16, #tpu.memory_space<vmem>>, vector<384x256xbf16>
    %cst = arith.constant dense<0.000000e+00> : vector<8x256xf32>
    %3 = tpu.matmul %1, %2, %cst {dimension_numbers = #tpu.dot_dimension_numbers<[1], [0], [0], [1], [0, 0, 1, 1], [], []>} : vector<8x384xbf16>, vector<384x256xbf16>, vector<8x256xf32> -> vector<8x256xf32>
    %4 = arith.truncf %3 : vector<8x256xf32> to vector<8x256xbf16>
    %5 = vector.extract_strided_slice %4 {offsets = [0, 0], sizes = [8, 128], strides = [1, 1]} : vector<8x256xbf16> to vector<8x128xbf16>
    %6 = vector.extract_strided_slice %4 {offsets = [0, 128], sizes = [8, 128], strides = [1, 1]} : vector<8x256xbf16> to vector<8x128xbf16>
    %cst_4 = arith.constant dense<0.000000e+00> : vector<8x8xf32>
    %7 = tpu.matmul %6, %5, %cst_4 {dimension_numbers = #tpu.dot_dimension_numbers<[1], [1], [0], [0], [0, 0, 1, 0], [], []>} : vector<8x128xbf16>, vector<8x128xbf16>, vector<8x8xf32> -> vector<8x8xf32>
    %8 = tpu.iota {dimensions = array<i32: 0>} : vector<8x8xi32>
    %c0_i32 = arith.constant 0 : i32
    %9 = vector.broadcast %c0_i32 : i32 to vector<8x8xi32>
    %10 = arith.addi %8, %9 : vector<8x8xi32>
    %11 = tpu.iota {dimensions = array<i32: 1>} : vector<8x8xi32>
    %12 = arith.cmpi sle, %11, %10 : vector<8x8xi32>
    %cst_5 = arith.constant 0xFF800000 : f32
    %13 = vector.broadcast %cst_5 : f32 to vector<8x8xf32>
    %14 = arith.select %12, %7, %13 : vector<8x8xi1>, vector<8x8xf32>
    %cst_6 = arith.constant dense<0xFF800000> : vector<8xf32>
    %15 = vector.multi_reduction <maximumf>, %14, %cst_6 [1] : vector<8x8xf32> to vector<8xf32>
    %16 = vector.shape_cast %15 : vector<8xf32> to vector<8x1xf32>
    %17 = vector.broadcast %16 : vector<8x1xf32> to vector<8x8xf32>
    %18 = arith.subf %14, %17 : vector<8x8xf32>
    %19 = math.exp %18 : vector<8x8xf32>
    %cst_7 = arith.constant dense<0.000000e+00> : vector<8xf32>
    %20 = vector.multi_reduction <add>, %19, %cst_7 [1] : vector<8x8xf32> to vector<8xf32>
    %21 = vector.shape_cast %20 : vector<8xf32> to vector<8x1xf32>
    %22 = tpu.reciprocal %21 {approx = true} : vector<8x1xf32> -> vector<8x1xf32>
    %23 = vector.broadcast %22 : vector<8x1xf32> to vector<8x8xf32>
    %24 = arith.mulf %19, %23 : vector<8x8xf32>
    %25 = arith.truncf %24 : vector<8x8xf32> to vector<8x8xbf16>
    %cst_8 = arith.constant dense<0.000000e+00> : vector<8x128xf32>
    %26 = tpu.matmul %25, %5, %cst_8 {dimension_numbers = #tpu.dot_dimension_numbers<[1], [0], [0], [1], [0, 0, 1, 1], [], []>} : vector<8x8xbf16>, vector<8x128xbf16>, vector<8x128xf32> -> vector<8x128xf32>
    %27 = vector.extract_strided_slice %26 {offsets = [0, 0], sizes = [8, 64], strides = [1, 1]} : vector<8x128xf32> to vector<8x64xf32>
    %c0_9 = arith.constant 0 : index
    %c0_10 = arith.constant 0 : index
    %c0_11 = arith.constant 0 : index
    %28 = vector.load %arg3[%c0_9, %c0_10, %c0_11] : memref<1x8x64xf32, #tpu.memory_space<vmem>>, vector<1x8x64xf32>
    %29 = vector.shape_cast %28 : vector<1x8x64xf32> to vector<8x64xf32>
    %30 = vector.shape_cast %27 : vector<8x64xf32> to vector<1x8x64xf32>
    tpu.vector_store %arg3[%c0_9, %c0_10, %c0_11], %30 {strides = array<i32>} : memref<1x8x64xf32, #tpu.memory_space<vmem>>, vector<1x8x64xf32>,
    return
  }
  func.func @transform_0(%arg0: i32) -> (i32, i32, i32) {
    %c0_i32 = arith.constant 0 : i32
    %c0_i32_0 = arith.constant 0 : i32
    %c0_i32_1 = arith.constant 0 : i32
    return %arg0, %c0_i32, %c0_i32_0 : i32, i32, i32
  }
  func.func @transform_1(%arg0: i32) -> (i32, i32) {
    %c0_i32 = arith.constant 0 : i32
    %c0_i32_0 = arith.constant 0 : i32
    %c0_i32_1 = arith.constant 0 : i32
    return %c0_i32, %c0_i32_0 : i32, i32
  }
  func.func @transform_2(%arg0: i32) -> (i32, i32, i32) {
    %c0_i32 = arith.constant 0 : i32
    %c0_i32_0 = arith.constant 0 : i32
    %c0_i32_1 = arith.constant 0 : i32
    return %arg0, %c0_i32, %c0_i32_0 : i32, i32, i32
  }
}

</mosaic_0001>

<bundles_post_ra>
// kernel: tpu_custom_call.1
= control target key start
LH: loop header
LB: loop body
LE: loop exit
PB: predicated region body
PF: predicated region fallthrough
CT: control target
= control target key end

     0   :  { %7 = vsyncpa [#allocation3], 0  ;;  %s1331_s0 = inlined_call_operand.hbm [shape: bf16[2,8,384], index: 0, kind: input, shape index: {}]   ;;  %s1332_s1 = inlined_call_operand.hbm [shape: bf16[384,256], index: 1, kind: input, shape index: {}]   ;;  %s1333_s2 = inlined_call_operand.hbm [shape: f32[2,8,64], index: 2, kind: output, shape index: {}]  }
   0x1   :  { %9 = vsyncpa [#allocation3 + $0x1], 0 }
   0x2   :  { %10 = vsyncpa [#allocation6], 0 }
   0x3   :  { %11 = vsyncpa [#allocation4], 0 }
   0x4   :  { %13 = vsyncpa [#allocation4 + $0x1], 0  ;;  %s1183_s9 = smov 0   ;;  %s1185_s10 = smov 0  }
   0x5   :  { %s1187_s11 = smov 0   ;;  %s1189_s12 = smov 0  }
   0x6 LB: > { %s108_s15 = sshll.u32 %s1332_s1, 4  ;;  %s1207_s16 = sadd.s32 4294967295, %s1163_s12   ;;  %s1163_s12 = sphi %s1189_s12, %s1343_s12   ;;  %s1159_s11 = sphi %s1187_s11, %s1342_s11   ;;  %s1155_s10 = sphi %s1185_s10, %s1341_s10   ;;  %s1151_s9 = sphi %s1183_s9, %s1340_s9   ;;  %s109_s15 = int_to_ptr.hbm [resolvable:$true] %s108_s15 }
   0x7   : > { %p715_p0 = scmp.ge.s32.totalorder %s1163_s12, 1  ;;  %p40_p1 = scmp.eq.s32.totalorder %s1207_s16, 0 }
   0x8   : > { %p97_p2 = scmp.lt.s32.totalorder %s1163_s12, 3  ;;  %s1165_s18 = smov [#allocation5]  }
   0x9   : > { %s110_s19 = sshll.u32 %s1165_s18, 4  ;;  %s1166_s20 = smov 128   ;;  %s111_s19 = int_to_ptr.vmem [resolvable:$true] %s110_s19 }
   0xa   : > { %p1212_p3 = pnand %p715_p0, %p97_p2  ;;  %s1167_s21 = smov 8  }
   0xb   : > { %s714_s22 = sadd.s32 4294967294, %s1163_s12   ;;  %s1223_s23 = sadd.s32 1, %s1163_s12  }
   0xc   : > { %p978_p4 = pneg %p1212_p3  ;;  %s26_s24 = sadd.s32 1, %s1159_s11 }
   0xd   : > { %s23_s25 = ssub.s32 %s1163_s12, %s1223_s23  ;;  %p33_p7 = scmp.ne.s32.totalorder %s1159_s11, %s1155_s10 }
   0xe   : > { %p979_p6 = pnand %p978_p4, %p40_p1  ;;  %p24_p8 = scmp.eq.s32.totalorder %s23_s25, 0 }
   0xf   : > { %p34_p9 = scmp.eq.s32.totalorder %s1163_s12, 0  ;;  %p39_p10 = scmp.ne.s32.totalorder %s1155_s10, %s1151_s9 }
  0x10   : > { %981 = dma.hbm_to_vmem [thread:$0]  (!%p979_p6), %s109_s15, 6144, %s111_s19, [#allocation6], %s1166_s20, %s1166_s20, %s1167_s21  }
  0x11   : > { %p84_p11 = scmp.eq.s32.totalorder %s1207_s16, 1  ;;  %p35_p12 = por %p34_p9, %p33_p7 }
  0x12   : > { %s1235_s26 = scalar_select %p24_p8, %s1159_s11, %s26_s24  }
  0x13   : > { %p1239_p13 = por %p40_p1, %p39_p10  ;;  %p1243_p0 = por %p84_p11, %p33_p7 }
  0x14   : > { %p90_p2 = scmp.eq.s32.totalorder %s714_s22, 1  ;;  %p991_p4 = scmp.lt.s32.totalorder %s1163_s12, 2 }
  0x15   : > { %s124_s29 = sand.u32 1, %s1159_s11   ;;  %s968_s5 = smul.u32 12, %s1163_s12 }
  0x16   : > { %p1249_p6 = por %p90_p2, %p39_p10  ;;  %s967_s3 = smul.u32 12, %s124_s29 }
  0x17   : > { %p1253_p8 = pnand %p991_p4, %p35_p12  ;;  %s133_s8 = scalar_lea.hbm %s1331_s0, %s968_s5 }
  0x18   : > { %s128_s13 = scalar_lea.vmem [#allocation2], %s967_s3  ;;  %s135_s15 = sshll.u32 %s133_s8, 4  ;;  %s136_s15 = int_to_ptr.hbm [resolvable:$true] %s135_s15 }
  0x19   : > { %s137_s14 = sshll.u32 %s128_s13, 4  ;;  %s125_s18 = scalar_lea.sflag [#allocation3], %s124_s29  ;;  %s138_s14 = int_to_ptr.vmem [resolvable:$true] %s137_s14 }
  0x1a   : > { %s1063_s19 = sshra.s32 %s136_s15, 4  ;;  %p1067_p9 = pneg %p1253_p8  ;;  %s1064_s19 = int_to_ptr.hbm [resolvable:$true] %s1063_s19 }
  0x1b   : > { %s1065_s20 = scalar_lea.hbm %s1064_s19, 12  ;;  %s1070_s24 = scalar_lea.hbm %s1331_s0, 24 }
  0x1c   : > { %p1066_p7 = scmp.ne.s32.totalorder %s1064_s19, %s1065_s20  ;;  %p1071_p12 = scmp.lt.s32.totalorder %s1064_s19, %s1331_s0 }
  0x1d   : > { %p1072_p2 = scmp.lt.s32.totalorder %s1070_s24, %s1065_s20 }
  0x1e   : > { %p1068_p10 = pnand %p1067_p9, %p1066_p7 }
  0x1f   : > { %p1073_p4 = por %p1072_p2, %p1071_p12 }
  0x20   : > { %p1069_p11 = pneg %p1068_p10 }
  0x22   : > { %p1074_p5 = pnand %p1073_p4, %p1069_p11 }
  0x24   : > { %1077 = shalt.err (!%p1074_p5)
}
  0x25   : > { %985 = dma.hbm_to_vmem [thread:$0]  (!%p1253_p8), %s136_s15, 192, %s138_s14, %s125_s18  }
  0x26   : > { %146 = sbr.rel (%p1212_p3) target bundleno = 780 (0x30c), region = 28  ;;  %s1274_s29 = sand.u32 (!%p1212_p3), 1, %s1155_s10  }
  0x27   : > { %s969_s3 = smul.u32 (!%p1212_p3), 12, %s1274_s29  ;;  %s149_s6 = scalar_lea.sflag (!%p1212_p3), [#allocation3], %s1274_s29 }
  0x29   : > { %s1278_s7 = scalar_lea.vmem (!%p1212_p3), [#allocation2], %s969_s3 }
  0x2b   : > { %1138 = dma.done.wait (%p1239_p13), %s149_s6, 192  }
  0x2c   : > { %1140 = vsyncadd (%p1239_p13), %s149_s6, 4294967104 }
  0x2d   : > { %1142 = dma.done.wait (%p40_p1), [#allocation6], 6144  }
  0x2e   : > { %1144 = vsyncadd (%p40_p1), [#allocation6], 4294961152  ;;  %v780_v0 = vld [vmem:[#allocation5 + $0x70] sm:$0xf]  ;;  %v934_v1 = vld [vmem:[#allocation5 + $0x74] sm:$0xf0] }
  0x2f   : > { %v844_v2 = vld [vmem:[#allocation5 + $0xf0] sm:$0xf]  ;;  %v781_v3 = vor.u32 %v934_v1, %v780_v0  ;;  %v950_v4 = vld [vmem:[#allocation5 + $0xf4] sm:$0xf0]  ;;  %v772_v5 = vld [vmem:[#allocation5 + $0x60] sm:$0xf] }
  0x30   : > { %v932_v6 = vld [vmem:[#allocation5 + $0x64] sm:$0xf0]  ;;  %v845_v7 = vor.u32 %v950_v4, %v844_v2  ;;  %v836_v8 = vld [vmem:[#allocation5 + $0xe0] sm:$0xf]  ;;  %v764_v11 = vld [vmem:[#allocation5 + $0x50] sm:$0xf] }
  0x31   : > { %v948_v9 = vld [vmem:[#allocation5 + $0xe4] sm:$0xf0]  ;;  %481 = vmatpush.bf16.msra.mxu0 %v781_v3  ;;  %v773_v10 = vor.u32 %v932_v6, %v772_v5  ;;  %v930_v13 = vld [vmem:[#allocation5 + $0x54] sm:$0xf0]  ;;  %v908_v14 = vld [vmem:[#allocation5 + $0x170] sm:$0xf] }
  0x32   : > { %494 = vmatpush.bf16.msra.mxu1 %v845_v7  ;;  %v837_v12 = vor.u32 %v948_v9, %v836_v8  ;;  %v966_v15 = vld [vmem:[#allocation5 + $0x174] sm:$0xf0]  ;;  %v828_v16 = vld [vmem:[#allocation5 + $0xd0] sm:$0xf]  ;;  %v900_v19 = vld [vmem:[#allocation5 + $0x160] sm:$0xf]  ;;  %v765_v22 = vor.u32 %v930_v13, %v764_v11 }
  0x33   : > { %v946_v17 = vld [vmem:[#allocation5 + $0xd4] sm:$0xf0]  ;;  %v909_v18 = vor.u32 %v966_v15, %v908_v14  ;;  %v964_v20 = vld [vmem:[#allocation5 + $0x164] sm:$0xf0]  ;;  %v933_v21 = vld [vmem:[#allocation5 + $0x74] sm:$0xf] }
  0x34   : > { %v756_v23 = vld [vmem:[#allocation5 + $0x40] sm:$0xf]  ;;  %v928_v24 = vld [vmem:[#allocation5 + $0x44] sm:$0xf0]  ;;  %v901_v25 = vor.u32 %v964_v20, %v900_v19  ;;  %v782_v26 = vld [vmem:[#allocation5 + $0x78] sm:$0xf0]  ;;  %v829_v27 = vor.u32 %v946_v17, %v828_v16 }
  0x35   : > { %482 = vmatpush.bf16.msra.mxu0 %v773_v10  ;;  %507 = vmatpush.bf16.msra.mxu2 %v909_v18  ;;  %v820_v28 = vld [vmem:[#allocation5 + $0xc0] sm:$0xf]  ;;  %v944_v29 = vld [vmem:[#allocation5 + $0xc4] sm:$0xf0]  ;;  %v785_v30 = vor.u32 %v933_v21, %v782_v26  ;;  %v892_v31 = vld [vmem:[#allocation5 + $0x150] sm:$0xf]  ;;  %v757_v36 = vor.u32 %v928_v24, %v756_v23 }
  0x36   : > { %495 = vmatpush.bf16.msra.mxu1 %v837_v12  ;;  %v962_v32 = vld [vmem:[#allocation5 + $0x154] sm:$0xf0]  ;;  %v931_v33 = vld [vmem:[#allocation5 + $0x64] sm:$0xf]  ;;  %v774_v34 = vld [vmem:[#allocation5 + $0x68] sm:$0xf0]  ;;  %v821_v41 = vor.u32 %v944_v29, %v820_v28 }
  0x37   : > { %520 = vmatpush.bf16.msra.mxu3 %v785_v30  ;;  %v777_v35 = vor.u32 %v931_v33, %v774_v34  ;;  %v748_v37 = vld [vmem:[#allocation5 + $0x30] sm:$0xf]  ;;  %v926_v38 = vld [vmem:[#allocation5 + $0x34] sm:$0xf0]  ;;  %v893_v39 = vor.u32 %v962_v32, %v892_v31  ;;  %v884_v40 = vld [vmem:[#allocation5 + $0x140] sm:$0xf] }
  0x38   : > { %v960_v42 = vld [vmem:[#allocation5 + $0x144] sm:$0xf0]  ;;  %v929_v43 = vld [vmem:[#allocation5 + $0x54] sm:$0xf]  ;;  %v766_v44 = vld [vmem:[#allocation5 + $0x58] sm:$0xf0]  ;;  %v749_v48 = vor.u32 %v926_v38, %v748_v37 }
  0x39   : > { %483 = vmatpush.bf16.msra.mxu0 %v765_v22  ;;  %508 = vmatpush.bf16.msra.mxu2 %v901_v25  ;;  %v812_v45 = vld [vmem:[#allocation5 + $0xb0] sm:$0xf]  ;;  %v942_v46 = vld [vmem:[#allocation5 + $0xb4] sm:$0xf0]  ;;  %v769_v47 = vor.u32 %v929_v43, %v766_v44  ;;  %v740_v49 = vld [vmem:[#allocation5 + $0x20] sm:$0xf]  ;;  %v885_v50 = vor.u32 %v960_v42, %v884_v40 }
  0x3a   : > { %496 = vmatpush.bf16.msra.mxu1 %v829_v27  ;;  %v927_v51 = vld [vmem:[#allocation5 + $0x44] sm:$0xf]  ;;  %v758_v52 = vld [vmem:[#allocation5 + $0x48] sm:$0xf0]  ;;  %v813_v53 = vor.u32 %v942_v46, %v812_v45  ;;  %v924_v54 = vld [vmem:[#allocation5 + $0x24] sm:$0xf0] }
  0x3b   : > { %521 = vmatpush.bf16.msra.mxu3 %v777_v35  ;;  %v876_v55 = vld [vmem:[#allocation5 + $0x130] sm:$0xf]  ;;  %v958_v56 = vld [vmem:[#allocation5 + $0x134] sm:$0xf0]  ;;  %v804_v57 = vld [vmem:[#allocation5 + $0xa0] sm:$0xf]  ;;  %v761_v59 = vor.u32 %v927_v51, %v758_v52  ;;  %v741_v60 = vor.u32 %v924_v54, %v740_v49 }
  0x3c   : > { %v940_v58 = vld [vmem:[#allocation5 + $0xa4] sm:$0xf0]  ;;  %v732_v61 = vld [vmem:[#allocation5 + $0x10] sm:$0xf]  ;;  %v877_v62 = vor.u32 %v958_v56, %v876_v55  ;;  %v925_v63 = vld [vmem:[#allocation5 + $0x34] sm:$0xf] }
  0x3d   : > { %484 = vmatpush.bf16.msra.mxu0 %v757_v36  ;;  %509 = vmatpush.bf16.msra.mxu2 %v893_v39  ;;  %v750_v0 = vld [vmem:[#allocation5 + $0x38] sm:$0xf0]  ;;  %v805_v1 = vor.u32 %v940_v58, %v804_v57  ;;  %v922_v2 = vld [vmem:[#allocation5 + $0x14] sm:$0xf0]  ;;  %v868_v3 = vld [vmem:[#allocation5 + $0x120] sm:$0xf] }
  0x3e   : > { %497 = vmatpush.bf16.msra.mxu1 %v821_v41  ;;  %v956_v4 = vld [vmem:[#allocation5 + $0x124] sm:$0xf0]  ;;  %v796_v5 = vld [vmem:[#allocation5 + $0x90] sm:$0xf]  ;;  %v938_v6 = vld [vmem:[#allocation5 + $0x94] sm:$0xf0]  ;;  %v753_v9 = vor.u32 %v925_v63, %v750_v0  ;;  %v733_v10 = vor.u32 %v922_v2, %v732_v61 }
  0x3f   : > { %522 = vmatpush.bf16.msra.mxu3 %v769_v47  ;;  %v724_v7 = vld [vmem:[#allocation5] sm:$0xf]  ;;  %v920_v8 = vld [vmem:[#allocation5 + $0x4] sm:$0xf0]  ;;  %v869_v11 = vor.u32 %v956_v4, %v868_v3  ;;  %v923_v12 = vld [vmem:[#allocation5 + $0x24] sm:$0xf]  ;;  %v797_v15 = vor.u32 %v938_v6, %v796_v5 }
  0x40   : > { %v742_v13 = vld [vmem:[#allocation5 + $0x28] sm:$0xf0]  ;;  %v788_v16 = vld [vmem:[#allocation5 + $0x80] sm:$0xf]  ;;  %v860_v17 = vld [vmem:[#allocation5 + $0x110] sm:$0xf]  ;;  %v725_v26 = vor.u32 %v920_v8, %v724_v7 }
  0x41   : > { %485 = vmatpush.bf16.msra.mxu0 %v749_v48  ;;  %510 = vmatpush.bf16.msra.mxu2 %v885_v50  ;;  %v180_v14 = vld [vmem:[%s1278_s7] sm:$0xff]  ;;  %v846_v21 = vld [vmem:[#allocation5 + $0xf8] sm:$0xf0]  ;;  %v745_v24 = vor.u32 %v923_v12, %v742_v13  ;;  %v852_v34 = vld [vmem:[#allocation5 + $0x100] sm:$0xf]  ;;  %vm599_vm0 = vcmask 1043456  }
  0x42   : > { %498 = vmatpush.bf16.msra.mxu1 %v813_v53  ;;  %v954_v18 = vld [vmem:[#allocation5 + $0x114] sm:$0xf0]  ;;  %v936_v19 = vld [vmem:[#allocation5 + $0x84] sm:$0xf0]  ;;  %v949_v20 = vld [vmem:[#allocation5 + $0xf4] sm:$0xf]  ;;  %v232_v25 = vunpack.c.l.b16 %v180_v14  ;;  %v233_v28 = vunpack.c.h.b16 %v180_v14 }
  0x43   : > { %523 = vmatpush.bf16.msra.mxu3 %v761_v59  ;;  %v965_v22 = vld [vmem:[#allocation5 + $0x174] sm:$0xf]  ;;  %v910_v23 = vld [vmem:[#allocation5 + $0x178] sm:$0xf0]  ;;  %v861_v27 = vor.u32 %v954_v18, %v860_v17  ;;  %v789_v32 = vor.u32 %v936_v19, %v788_v16  ;;  %v849_v33 = vor.u32 %v949_v20, %v846_v21  ;;  %v952_v35 = vld [vmem:[#allocation5 + $0x104] sm:$0xf0] }
  0x44   : > { %v921_v29 = vld [vmem:[#allocation5 + $0x14] sm:$0xf]  ;;  %v734_v30 = vld [vmem:[#allocation5 + $0x18] sm:$0xf0]  ;;  %v913_v36 = vor.u32 %v965_v22, %v910_v23  ;;  %v947_v37 = vld [vmem:[#allocation5 + $0xe4] sm:$0xf]  ;;  %v235_v41 = vpack.c.b16 %v232_v25, %v232_v25  ;;  %v853_v44 = vor.u32 %v952_v35, %v852_v34  ;;  %v1290_v45 = vpack.c.b16 %v233_v28, %v233_v28 }
  0x45   : > { %486 = vmatpush.bf16.msra.mxu0 %v741_v60  ;;  %511 = vmatpush.bf16.msra.mxu2 %v877_v62  ;;  %v181_v31 = vld [vmem:[%s1278_s7 + $0x8] sm:$0xf]  ;;  %v838_v38 = vld [vmem:[#allocation5 + $0xe8] sm:$0xf0]  ;;  %v963_v39 = vld [vmem:[#allocation5 + $0x164] sm:$0xf]  ;;  %v737_v42 = vor.u32 %v921_v29, %v734_v30 }
  0x46   : > { %499 = vmatpush.bf16.msra.mxu1 %v805_v1  ;;  %v902_v40 = vld [vmem:[#allocation5 + $0x168] sm:$0xf0]  ;;  %v234_v43 = vunpack.c.l.b16 %v181_v31  ;;  %v919_v46 = vld [vmem:[#allocation5 + $0x4] sm:$0xf]  ;;  %v841_v48 = vor.u32 %v947_v37, %v838_v38  ;;  %v945_v50 = vld [vmem:[#allocation5 + $0xd4] sm:$0xf] }
  0x47   : > { %524 = vmatpush.bf16.msra.mxu3 %v753_v9  ;;  %v726_v47 = vld [vmem:[#allocation5 + $0x8] sm:$0xf0]  ;;  %v905_v49 = vor.u32 %v963_v39, %v902_v40  ;;  %v830_v51 = vld [vmem:[#allocation5 + $0xd8] sm:$0xf0]  ;;  %v961_v52 = vld [vmem:[#allocation5 + $0x154] sm:$0xf] }
  0x48   : > { %v894_v53 = vld [vmem:[#allocation5 + $0x158] sm:$0xf0]  ;;  %v237_v54 = vpack.c.b16 %v234_v43, %v234_v43  ;;  %v729_v55 = vor.u32 %v919_v46, %v726_v47  ;;  %v833_v56 = vor.u32 %v945_v50, %v830_v51  ;;  %v943_v58 = vld [vmem:[#allocation5 + $0xc4] sm:$0xf]  ;;  %v822_v59 = vld [vmem:[#allocation5 + $0xc8] sm:$0xf0] }
  0x49   : > { %487 = vmatpush.bf16.msra.mxu0 %v733_v10  ;;  %512 = vmatpush.bf16.msra.mxu2 %v869_v11  ;;  %v897_v57 = vor.u32 %v961_v52, %v894_v53  ;;  %v959_v60 = vld [vmem:[#allocation5 + $0x144] sm:$0xf]  ;;  %v886_v61 = vld [vmem:[#allocation5 + $0x148] sm:$0xf0]  ;;  %v825_v62 = vor.u32 %v943_v58, %v822_v59  ;;  %v941_v0 = vld [vmem:[#allocation5 + $0xb4] sm:$0xf] }
  0x4a   : > { %500 = vmatpush.bf16.msra.mxu1 %v797_v15  ;;  %v889_v63 = vor.u32 %v959_v60, %v886_v61  ;;  %v814_v1 = vld [vmem:[#allocation5 + $0xb8] sm:$0xf0]  ;;  %v957_v2 = vld [vmem:[#allocation5 + $0x134] sm:$0xf]  ;;  %v939_v6 = vld [vmem:[#allocation5 + $0xa4] sm:$0xf] }
  0x4b   : > { %525 = vmatpush.bf16.msra.mxu3 %v745_v24  ;;  %v878_v3 = vld [vmem:[#allocation5 + $0x138] sm:$0xf0]  ;;  %v817_v4 = vor.u32 %v941_v0, %v814_v1  ;;  %v806_v7 = vld [vmem:[#allocation5 + $0xa8] sm:$0xf0]  ;;  %v955_v8 = vld [vmem:[#allocation5 + $0x124] sm:$0xf] }
  0x4c   : > { %v881_v5 = vor.u32 %v957_v2, %v878_v3  ;;  %v870_v9 = vld [vmem:[#allocation5 + $0x128] sm:$0xf0]  ;;  %v809_v10 = vor.u32 %v939_v6, %v806_v7  ;;  %v937_v12 = vld [vmem:[#allocation5 + $0x94] sm:$0xf]  ;;  %v798_v13 = vld [vmem:[#allocation5 + $0x98] sm:$0xf0] }
  0x4d   : > { %488 = vmatpush.bf16.msra.mxu0 %v725_v26  ;;  %513 = vmatpush.bf16.msra.mxu2 %v861_v27  ;;  %v873_v11 = vor.u32 %v955_v8, %v870_v9  ;;  %v953_v14 = vld [vmem:[#allocation5 + $0x114] sm:$0xf]  ;;  %v862_v15 = vld [vmem:[#allocation5 + $0x118] sm:$0xf0]  ;;  %v801_v16 = vor.u32 %v937_v12, %v798_v13  ;;  %v935_v18 = vld [vmem:[#allocation5 + $0x84] sm:$0xf] }
  0x4e   : > { %501 = vmatpush.bf16.msra.mxu1 %v789_v32  ;;  %v865_v17 = vor.u32 %v953_v14, %v862_v15  ;;  %v790_v19 = vld [vmem:[#allocation5 + $0x88] sm:$0xf0]  ;;  %v951_v20 = vld [vmem:[#allocation5 + $0x104] sm:$0xf]  ;;  %vm583_vm2 = vcmask 64512   ;;  %s916_s17 = sshll.u32 %s1207_s16, 3 }
  0x4f   : > { %526 = vmatpush.bf16.msra.mxu3 %v737_v42  ;;  %v854_v21 = vld [vmem:[#allocation5 + $0x108] sm:$0xf0]  ;;  %v793_v22 = vor.u32 %v935_v18, %v790_v19  ;;  %s721_s27 = sshll.u32 %s1274_s29, 3  ;;  %s629_s13 = scalar_lea.hbm %s1333_s2, %s916_s17  ;;  %vm616_vm3 = vcmask 523264  }
  0x50   : > { %489 = vmatmul.bf16.vlgmr.msra.gmra.mxu0 %v235_v41  ;;  %v857_v23 = vor.u32 %v951_v20, %v854_v21  ;;  %s178_s14 = scalar_lea.vmem [#allocation7], %s721_s27  ;;  %s633_s18 = sshll.u32 %s629_s13, 4  ;;  %s634_s18 = int_to_ptr.hbm [resolvable:$true] %s633_s18 }
  0x51   : > { %533 = vmatpush.bf16.msrb.mxu0 %v849_v33  ;;  %514 = vmatpush.bf16.msra.mxu2 %v853_v44  ;;  %v577_v44 = vlaneseq  ;;  %s631_s15 = sshll.u32 %s178_s14, 4  ;;  %s619_s19 = scalar_lea.sflag [#allocation4], %s1274_s29  ;;  %s632_s15 = int_to_ptr.vmem [resolvable:$true] %s631_s15 }
  0x52   : > { %546 = vmatpush.bf16.msrb.mxu1 %v913_v36  ;;  %s1107_s20 = sshra.s32 %s634_s18, 4  ;;  %s1113_s24 = scalar_lea.hbm %s1333_s2, 16  ;;  %s1108_s20 = int_to_ptr.hbm [resolvable:$true] %s1107_s20 }
  0x53   : > { %502 = vmatmul.bf16.vlgmr.msra.gmra.mxu1 %v1290_v45  ;;  %527 = vmatpush.bf16.msra.mxu3 %v729_v55  ;;  %v580_v46 = vand.u32 127, %v577_v44  ;;  %s1109_s21 = scalar_lea.hbm %s1108_s20, 8  ;;  %p1114_p13 = scmp.lt.s32.totalorder %s1108_s20, %s1333_s2 }
  0x54   : > { %515 = vmatmul.bf16.vlgmr.msra.gmra.mxu2 %v237_v54  ;;  %p1110_p1 = scmp.ne.s32.totalorder %s1108_s20, %s1109_s21  ;;  %p1115_p8 = scmp.lt.s32.totalorder %s1113_s24, %s1109_s21 }
  0x55   : > { %534 = vmatpush.bf16.msrb.mxu0 %v841_v48 }
  0x56   : > { %547 = vmatpush.bf16.msrb.mxu1 %v905_v49  ;;  %528 = vmatmul.bf16.vlgmr.msra.gmra.mxu3 %v235_v41  ;;  %p1111_p3 = pnand %p1110_p1, %p1243_p0  ;;  %p1116_p7 = por %p1115_p8, %p1114_p13 }
  0x58   : > { %p1112_p5 = pneg %p1111_p3 }
  0x59   : > { %535 = vmatpush.bf16.msrb.mxu0 %v833_v56 }
  0x5a   : > { %548 = vmatpush.bf16.msrb.mxu1 %v897_v57  ;;  %p1117_p9 = pnand %p1116_p7, %p1112_p5 }
  0x5d   : > { %536 = vmatpush.bf16.msrb.mxu0 %v825_v62 }
  0x5e   : > { %549 = vmatpush.bf16.msrb.mxu1 %v889_v63 }
  0x61   : > { %537 = vmatpush.bf16.msrb.mxu0 %v817_v4 }
  0x62   : > { %550 = vmatpush.bf16.msrb.mxu1 %v881_v5 }
  0x65   : > { %538 = vmatpush.bf16.msrb.mxu0 %v809_v10 }
  0x66   : > { %551 = vmatpush.bf16.msrb.mxu1 %v873_v11 }
  0x69   : > { %539 = vmatpush.bf16.msrb.mxu0 %v801_v16 }
  0x6a   : > { %552 = vmatpush.bf16.msrb.mxu1 %v865_v17 }
  0x6d   : > { %540 = vmatpush.bf16.msrb.mxu0 %v793_v22 }
  0x6e   : > { %553 = vmatpush.bf16.msrb.mxu1 %v857_v23 }
  0x70   : > { %541 = vmatmul.bf16.vlgmr.msrb.gmra.mxu0 %v1290_v45  ;;  %v578_v45 = vshrl.u32 %v577_v44, 7 }
  0x71   : > { %554 = vmatmul.bf16.vlgmr.msrb.gmra.mxu1 %v237_v54 }
  0x72   : > { %vm581_vm1 = vcmp.le.s32.totalorder %v580_v46, %v578_v45 }
  0xcd   : > { %v490_v24 = vpop.f32.mrf.mxu0 }
  0xd0   : > { %v503_v25 = vpop.f32.mrf.mxu1 }
  0xd1   : > { %v504_v32 = vadd.f32 %v503_v25, %v490_v24 }
  0xd5   : > { %v492_v26 = vpop.f32.mrf.mxu0 }
  0xd7   : > { %v516_v28 = vpop.f32.mrf.mxu2 }
  0xd8   : > { %v505_v27 = vpop.f32.mrf.mxu1  ;;  %v517_v36 = vadd.f32 %v516_v28, %v504_v32 }
  0xd9   : > { %v529_v29 = vpop.f32.mrf.mxu3 }
  0xdf   : > { %v518_v30 = vpop.f32.mrf.mxu2 }
  0xe1   : > { %v531_v31 = vpop.f32.mrf.mxu3 }
  0xed   : > { %v542_v33 = vpop.f32.mrf.mxu0 }
  0xee   : > { %v543_v34 = vadd.f32 %v542_v33, %v529_v29  ;;  %v555_v35 = vpop.f32.mrf.mxu1 }
  0xf0   : > { %v556_v37 = vadd.f32 %v555_v35, %v543_v34 }
  0xf2   : > { %v559_v38 = vpack.c.bf16 %v556_v37, %v517_v36 }
  0xf4   : > { %571 = vmatpush.bf16.xpose.msrb.mxu2 %v559_v38  ;;  %v601_v39 = vsel %vm599_vm0, %v559_v38, 0  ;;  %v561_v41 = vunpack.c.h.b16 %v559_v38 }
  0xf5   : > { %v544_v40 = vpop.f32.mrf.mxu0  ;;  %610 = vmatpush.bf16.msrb.mxu3 %v601_v39 }
  0xf6   : > { %v557_v42 = vpop.f32.mrf.mxu1  ;;  %v562_v43 = vpack.c.b16 %v561_v41, %v561_v41 }
  0xfb   : > { %572 = vmatmul.bf16.vlgmr.msrb.gmra.mxu2 %v562_v43 }
 0x17e   : > { %v573_v47 = vpop.f32.mrf.mxu2 }
 0x17f   : > { %v582_v48 = vsel %vm581_vm1, %v573_v47, -inf }
 0x180   : > { %v584_v49 = vsel %vm583_vm2, %v582_v48, -inf }
 0x181   : > { %585 = vmax.xlane.f32.xlu0 %v584_v49 }
 0x186   : > { %v575_v50 = vpop.f32.mrf.mxu2 }
 0x1f4   : > { %v586_v51 = vpop.xlane.xlu0 %585 }
 0x1f5   : > { %v587_v52 = vsub.f32 %v582_v48, %v586_v51 }
 0x1f7   : > { %v588_v53 = vmul.f32 1.442695, %v587_v52 }
 0x1f9   : > { %1029 = vpow2.f32 %v588_v53 }
 0x1ff   : > { %v1030_v54 = vpop.eup %1029 }
 0x200   : > { %v590_v55 = vsel %vm583_vm2, %v1030_v54, 0.0 }
 0x201   : > { %591 = vadd.xlane.f32.xlu0 %v590_v55 }
 0x274   : > { %v592_v56 = vpop.xlane.xlu0 %591 }
 0x275   : > { %1031 = vrcp.f32 %v592_v56 }
 0x27b   : > { %v1032_v57 = vpop.eup %1031 }
 0x27c   : > { %v594_v58 = vmul.f32 %v1032_v57, %v1030_v54 }
 0x27e   : > { %v595_v59 = vpack.c.bf16 %v594_v58, %v594_v58 }
 0x280   : > { %914 = vmatmul.msk.bf16.vlgmr.msrb.gmra.mxu3 %vm583_vm2, %v595_v59 }
 0x303   : > { %v612_v60 = vpop.f32.mrf.mxu3 }
 0x304   : > { %617 = vst.msk [vmem:[%s178_s14] sm:$0xff] %vm616_vm3, %v612_v60 }
 0x305   : > { %1120 = shalt.err (!%p1117_p9)
}
 0x306   : > { %976 = dma.vmem_to_hbm [thread:$0]  (%p1243_p0), %s632_s15, 128, %s634_s18, %s619_s19  }
 0x30b   : > { %v614_v61 = vpop.f32.mrf.mxu3 }
 0x30c PF: > { %s645_s29 = sand.u32 1, %s1151_s9   ;;  %p1339_p10 = scmp.ge.s32.totalorder %s1163_s12, 2 }
 0x30d   : > { %s646_s3 = scalar_lea.sflag [#allocation4], %s645_s29 }
 0x30e   : > { %p987_p11 = pnand %p1339_p10, %p1249_p6 }
 0x310   : > { %p988_p12 = pneg %p987_p11 }
 0x312   : > { %1146 = dma.done.wait (%p988_p12), %s646_s3, 128  }
 0x313   : > { %1148 = vsyncadd (%p988_p12), %s646_s3, 4294967168  ;;  %p16_p2 = scmp.ge.s32.totalorder %s1223_s23, 4   ;;  %s1340_s9 = smov %s1155_s10 }
 0x314   : > { %s1341_s10 = smov %s1159_s11  ;;  %s1342_s11 = smov %s1235_s26 }
 0x315   : > { %s1343_s12 = smov %s1223_s23  ;;  %18 = sbr.rel (!%p16_p2) target bundleno = 6 (0x6), region = 77 }
 0x31a   :  { %652 = vsyncpa [#allocation3], 1 }
 0x31b   :  { %654 = vsyncpa [#allocation3 + $0x1], 1 }
 0x31c   :  { %655 = vsyncpa [#allocation6], 1 }
 0x31d   :  { %656 = vsyncpa [#allocation4], 1 }
 0x31e   :  { %658 = vsyncpa [#allocation4 + $0x1], 1 }

</bundles_post_ra>
